<compile_context>
chip_gen: v6e
topology: v6e:2x2x1
jax: 0.10.0
libtpu: 0.0.40
codegen_flags: <defaults>
</compile_context>

<pallas_src>
import jax
import jax.numpy as jnp
from jax.experimental import pallas as pl
from jax.experimental.pallas import tpu as pltpu

# "cfg" values for this synthetic instantiation (kept (8,128)-friendly).
TEXT_DIMENSION = 128
GAN_CONDITION_DIM = 128
BATCH = 256


def canet_kernel(text_ref, w_ref, b_ref, eps_ref, c_ref, mu_ref, lv_ref):
    c_dim = eps_ref.shape[-1]

    # x = relu(text @ W + b)  -> (TILE_B, 2*C_DIM)
    # bf16 MXU inputs (W already bf16), f32 accumulation; elementwise stays
    # f32 (v5e has no bf16 VPU/EUP path).
    x = jnp.dot(text_ref[...].astype(jnp.bfloat16), w_ref[...],
                preferred_element_type=jnp.float32)
    x = jnp.maximum(x + b_ref[...], 0.0)

    mu = x[:, :c_dim]
    logvar = x[:, c_dim:]

    # reparametrize: c = eps * exp(0.5 * logvar) + mu   (EUP exp, VPU fma)
    std = jnp.exp(0.5 * logvar)

    # Three lane-dense (>=128 lane) outputs -> unmasked vst, no wrapper slices.
    c_ref[...] = eps_ref[...] * std + mu
    mu_ref[...] = mu
    lv_ref[...] = logvar


def _default_num_tiles():
    """1 tile on single-TC chips (v5e/v6e); 2 parallel tiles on dual-TC v7x."""
    try:
        kind = jax.devices()[0].device_kind.lower()
        if "v7" in kind or "7x" in kind:
            return 2
    except Exception:
        pass
    return 1


def canet_forward(text_embedding, w_bf16, b, eps, *, num_tiles=None):
    B, text_dim = text_embedding.shape
    c_dim = eps.shape[-1]
    two_c = 2 * c_dim
    assert w_bf16.shape == (text_dim, two_c)
    assert w_bf16.dtype == jnp.bfloat16        # pre-cast once at init/load time
    assert b.shape == (1, two_c)

    if num_tiles is None:
        num_tiles = _default_num_tiles()
    # No jnp.pad path: tile must divide B exactly and stay sublane-aligned.
    if B % num_tiles != 0 or (B // num_tiles) % 8 != 0:
        num_tiles = 1
    tile_b = B // num_tiles
    assert B % tile_b == 0 and tile_b % 8 == 0

    out_shapes = (
        jax.ShapeDtypeStruct((B, c_dim), jnp.float32),   # c
        jax.ShapeDtypeStruct((B, c_dim), jnp.float32),   # mu
        jax.ShapeDtypeStruct((B, c_dim), jnp.float32),   # logvar
    )

    c, mu, logvar = pl.pallas_call(
        canet_kernel,
        out_shape=out_shapes,
        grid=(num_tiles,),
        in_specs=[
            pl.BlockSpec((tile_b, text_dim), lambda i: (i, 0)),   # text tile
            pl.BlockSpec((text_dim, two_c), lambda i: (0, 0)),    # full W (resident)
            pl.BlockSpec((1, two_c), lambda i: (0, 0)),           # full bias
            pl.BlockSpec((tile_b, c_dim), lambda i: (i, 0)),      # eps tile
        ],
        out_specs=(
            pl.BlockSpec((tile_b, c_dim), lambda i: (i, 0)),      # c
            pl.BlockSpec((tile_b, c_dim), lambda i: (i, 0)),      # mu
            pl.BlockSpec((tile_b, c_dim), lambda i: (i, 0)),      # logvar
        ),
        compiler_params=pltpu.CompilerParams(
            dimension_semantics=("parallel",)),                   # megacore on v7x
    )(text_embedding, w_bf16, b, eps)

    return c, mu, logvar


def _init_params(key, text_dim, c_dim):
    # Deterministic init mimicking nn.Linear default: U(-1/sqrt(in), 1/sqrt(in)).
    # Weight is pre-cast to bf16 here (once), per review: no per-call astype.
    kw, kb = jax.random.split(key)
    bound = 1.0 / jnp.sqrt(jnp.float32(text_dim))
    w = jax.random.uniform(kw, (text_dim, 2 * c_dim), jnp.float32, -bound, bound)
    b = jax.random.uniform(kb, (1, 2 * c_dim), jnp.float32, -bound, bound)
    return w.astype(jnp.bfloat16), b, w


if __name__ == "__main__":
    key = jax.random.PRNGKey(0)
    k_params, k_text, k_eps = jax.random.split(key, 3)

    w_bf16, b, w_f32 = _init_params(k_params, TEXT_DIMENSION, GAN_CONDITION_DIM)
    text = jax.random.normal(k_text, (BATCH, TEXT_DIMENSION), jnp.float32)
    # Reparametrization noise (torch.randn equivalent), generated in-script.
    eps = jax.random.normal(k_eps, (BATCH, GAN_CONDITION_DIM), jnp.float32)

    c, mu, logvar = canet_forward(text, w_bf16, b, eps)
    jax.block_until_ready((c, mu, logvar))

    # Pure-JAX reference of the same math (same bf16 matmul inputs, f32 acc).
    x_ref = jnp.maximum(
        jnp.dot(text.astype(jnp.bfloat16), w_bf16,
                preferred_element_type=jnp.float32) + b, 0.0)
    mu_ref = x_ref[:, :GAN_CONDITION_DIM]
    lv_ref = x_ref[:, GAN_CONDITION_DIM:]
    c_ref = eps * jnp.exp(0.5 * lv_ref) + mu_ref
    assert jnp.allclose(mu, mu_ref, atol=1e-3, rtol=1e-3)
    assert jnp.allclose(logvar, lv_ref, atol=1e-3, rtol=1e-3)
    assert jnp.allclose(c, c_ref, atol=1e-3, rtol=1e-3)

    print("KERNEL_OK")
</pallas_src>

<mosaic_0001>
module attributes {stable_mosaic.version = 11 : i64} {
  func.func @canet_kernel(%arg0: i32, %arg1: memref<256x128xf32, #tpu.memory_space<vmem>>, %arg2: memref<128x256xbf16, #tpu.memory_space<vmem>>, %arg3: memref<1x256xf32, #tpu.memory_space<vmem>>, %arg4: memref<256x128xf32, #tpu.memory_space<vmem>>, %arg5: memref<256x128xf32, #tpu.memory_space<vmem>>, %arg6: memref<256x128xf32, #tpu.memory_space<vmem>>, %arg7: memref<256x128xf32, #tpu.memory_space<vmem>>) attributes {dimension_semantics = [#tpu.dimension_semantics<parallel>], iteration_bounds = array<i64: 1>, scalar_prefetch = 0 : i64, scratch_operands = 0 : i64, tpu.core_type = #tpu.core_type<tc>, window_params = [{transform_indices = @transform_0, window_bounds = array<i64: 256, 128>}, {pipeline_mode = #tpu.pipeline_mode<synchronous>, transform_indices = @transform_1, window_bounds = array<i64: 128, 256>}, {pipeline_mode = #tpu.pipeline_mode<synchronous>, transform_indices = @transform_2, window_bounds = array<i64: 1, 256>}, {transform_indices = @transform_3, window_bounds = array<i64: 256, 128>}, {transform_indices = @transform_4, window_bounds = array<i64: 256, 128>}, {transform_indices = @transform_5, window_bounds = array<i64: 256, 128>}, {transform_indices = @transform_6, window_bounds = array<i64: 256, 128>}]} {
    %c0 = arith.constant 0 : index
    %c0_0 = arith.constant 0 : index
    %0 = vector.load %arg1[%c0, %c0_0] : memref<256x128xf32, #tpu.memory_space<vmem>>, vector<256x128xf32>
    %1 = arith.truncf %0 : vector<256x128xf32> to vector<256x128xbf16>
    %c0_1 = arith.constant 0 : index
    %c0_2 = arith.constant 0 : index
    %2 = vector.load %arg2[%c0_1, %c0_2] : memref<128x256xbf16, #tpu.memory_space<vmem>>, vector<128x256xbf16>
    %cst = arith.constant dense<0.000000e+00> : vector<256x256xf32>
    %3 = tpu.matmul %1, %2, %cst {dimension_numbers = #tpu.dot_dimension_numbers<[1], [0], [0], [1], [0, 0, 1, 1], [], []>} : vector<256x128xbf16>, vector<128x256xbf16>, vector<256x256xf32> -> vector<256x256xf32>
    %c0_3 = arith.constant 0 : index
    %c0_4 = arith.constant 0 : index
    %4 = vector.load %arg3[%c0_3, %c0_4] : memref<1x256xf32, #tpu.memory_space<vmem>>, vector<1x256xf32>
    %5 = vector.broadcast %4 : vector<1x256xf32> to vector<256x256xf32>
    %6 = arith.addf %3, %5 : vector<256x256xf32>
    %cst_5 = arith.constant 0.000000e+00 : f32
    %7 = vector.broadcast %cst_5 : f32 to vector<256x256xf32>
    %8 = arith.maximumf %6, %7 : vector<256x256xf32>
    %9 = vector.extract_strided_slice %8 {offsets = [0, 0], sizes = [256, 128], strides = [1, 1]} : vector<256x256xf32> to vector<256x128xf32>
    %10 = vector.extract_strided_slice %8 {offsets = [0, 128], sizes = [256, 128], strides = [1, 1]} : vector<256x256xf32> to vector<256x128xf32>
    %cst_6 = arith.constant 5.000000e-01 : f32
    %11 = vector.broadcast %cst_6 : f32 to vector<256x128xf32>
    %12 = arith.mulf %11, %10 : vector<256x128xf32>
    %13 = math.exp %12 : vector<256x128xf32>
    %c0_7 = arith.constant 0 : index
    %c0_8 = arith.constant 0 : index
    %14 = vector.load %arg4[%c0_7, %c0_8] : memref<256x128xf32, #tpu.memory_space<vmem>>, vector<256x128xf32>
    %15 = arith.mulf %14, %13 : vector<256x128xf32>
    %16 = arith.addf %15, %9 : vector<256x128xf32>
    %c0_9 = arith.constant 0 : index
    %c0_10 = arith.constant 0 : index
    %17 = vector.load %arg5[%c0_9, %c0_10] : memref<256x128xf32, #tpu.memory_space<vmem>>, vector<256x128xf32>
    tpu.vector_store %arg5[%c0_9, %c0_10], %16 {strides = array<i32>} : memref<256x128xf32, #tpu.memory_space<vmem>>, vector<256x128xf32>,
    %c0_11 = arith.constant 0 : index
    %c0_12 = arith.constant 0 : index
    %18 = vector.load %arg6[%c0_11, %c0_12] : memref<256x128xf32, #tpu.memory_space<vmem>>, vector<256x128xf32>
    tpu.vector_store %arg6[%c0_11, %c0_12], %9 {strides = array<i32>} : memref<256x128xf32, #tpu.memory_space<vmem>>, vector<256x128xf32>,
    %c0_13 = arith.constant 0 : index
    %c0_14 = arith.constant 0 : index
    %19 = vector.load %arg7[%c0_13, %c0_14] : memref<256x128xf32, #tpu.memory_space<vmem>>, vector<256x128xf32>
    tpu.vector_store %arg7[%c0_13, %c0_14], %10 {strides = array<i32>} : memref<256x128xf32, #tpu.memory_space<vmem>>, vector<256x128xf32>,
    return
  }
  func.func @transform_0(%arg0: i32) -> (i32, i32) {
    %c0_i32 = arith.constant 0 : i32
    %c0_i32_0 = arith.constant 0 : i32
    return %arg0, %c0_i32 : i32, i32
  }
  func.func @transform_1(%arg0: i32) -> (i32, i32) {
    %c0_i32 = arith.constant 0 : i32
    %c0_i32_0 = arith.constant 0 : i32
    %c0_i32_1 = arith.constant 0 : i32
    return %c0_i32, %c0_i32_0 : i32, i32
  }
  func.func @transform_2(%arg0: i32) -> (i32, i32) {
    %c0_i32 = arith.constant 0 : i32
    %c0_i32_0 = arith.constant 0 : i32
    %c0_i32_1 = arith.constant 0 : i32
    return %c0_i32, %c0_i32_0 : i32, i32
  }
  func.func @transform_3(%arg0: i32) -> (i32, i32) {
    %c0_i32 = arith.constant 0 : i32
    %c0_i32_0 = arith.constant 0 : i32
    return %arg0, %c0_i32 : i32, i32
  }
  func.func @transform_4(%arg0: i32) -> (i32, i32) {
    %c0_i32 = arith.constant 0 : i32
    %c0_i32_0 = arith.constant 0 : i32
    return %arg0, %c0_i32 : i32, i32
  }
  func.func @transform_5(%arg0: i32) -> (i32, i32) {
    %c0_i32 = arith.constant 0 : i32
    %c0_i32_0 = arith.constant 0 : i32
    return %arg0, %c0_i32 : i32, i32
  }
  func.func @transform_6(%arg0: i32) -> (i32, i32) {
    %c0_i32 = arith.constant 0 : i32
    %c0_i32_0 = arith.constant 0 : i32
    return %arg0, %c0_i32 : i32, i32
  }
}

</mosaic_0001>

<bundles_post_ra>
// kernel: tpu_custom_call.1
= control target key start
LH: loop header
LB: loop body
LE: loop exit
PB: predicated region body
PF: predicated region fallthrough
CT: control target
= control target key end

     0   :  { %12 = vsyncpa [#allocation3], 0  ;;  %s1469_s0 = inlined_call_operand.hbm [shape: f32[256,128], index: 0, kind: input, shape index: {}]   ;;  %s1470_s1 = inlined_call_operand.hbm [shape: bf16[128,256], index: 1, kind: input, shape index: {}]   ;;  %s1471_s2 = inlined_call_operand.vmem [shape: f32[1,256], index: 2, kind: input, shape index: {}]   ;;  %s1472_s3 = inlined_call_operand.hbm [shape: f32[256,128], index: 3, kind: input, shape index: {}]   ;;  %s1473_s4 = inlined_call_operand.hbm [shape: f32[256,128], index: 4, kind: output, shape index: {0}]   ;;  %s1474_s5 = inlined_call_operand.hbm [shape: f32[256,128], index: 5, kind: output, shape index: {1}]   ;;  %s1475_s6 = inlined_call_operand.hbm [shape: f32[256,128], index: 6, kind: output, shape index: {2}]  }
   0x1   :  { %13 = vsyncpa [#allocation6], 0 }
   0x2   :  { %14 = vsyncpa [#allocation4], 0 }
   0x3   :  { %15 = vsyncpa [#allocation10], 0  ;;  %s1071_s21 = smov [#allocation5]   ;;  %s1072_s23 = smov [#allocation2]  }
   0x4   :  { %s33_s22 = sshll.u32 %s1071_s21, 4  ;;  %s21_s24 = sshll.u32 %s1072_s23, 4  ;;  %s34_s22 = int_to_ptr.vmem [resolvable:$true] %s33_s22  ;;  %s22_s24 = int_to_ptr.vmem [resolvable:$true] %s21_s24 }
   0x5   :  { %s951_s25 = scalar_lea.vmem %s34_s22, 2048  ;;  %p956_p1 = scmp.lt.s32.totalorder %s34_s22, %s34_s22 }
   0x6   :  { %p952_p0 = scmp.ne.s32.totalorder %s34_s22, %s951_s25  ;;  %p957_p2 = scmp.lt.s32.totalorder %s951_s25, %s951_s25 }
   0x8   :  { %p958_p3 = por %p957_p2, %p956_p1 }
   0xa   :  { %p959_p4 = pnand %p958_p3, %p952_p0 }
   0xc   :  { %962 = shalt.err (!%p959_p4)
}
   0xd   :  { %s1073_s26 = smov 128   ;;  %s1074_s27 = smov 8  }
   0xe   :  { %39 = dma.hbm_to_vmem [thread:$0]  %s1470_s1, 2048, %s34_s22, [#allocation6], %s1073_s26, %s1073_s26, %s1074_s27  }
   0xf   :  { %s971_s30 = scalar_lea.vmem %s22_s24, 4096  ;;  %p976_p6 = scmp.lt.s32.totalorder %s22_s24, %s22_s24 }
  0x10   :  { %p972_p5 = scmp.ne.s32.totalorder %s22_s24, %s971_s30  ;;  %p977_p7 = scmp.lt.s32.totalorder %s971_s30, %s971_s30 }
  0x12   :  { %p978_p8 = por %p977_p7, %p976_p6 }
  0x14   :  { %p979_p9 = pnand %p978_p8, %p972_p5 }
  0x16   :  { %982 = shalt.err (!%p979_p9)
}
  0x17   :  { %27 = dma.hbm_to_vmem [thread:$0]  %s1469_s0, 4096, %s22_s24, [#allocation3], %s1073_s26, %s1073_s26, %s1074_s27  }
  0x18   :  { %s1075_s9 = smov [#allocation7]  }
  0x19   :  { %s47_s10 = sshll.u32 %s1075_s9, 4  ;;  %s48_s10 = int_to_ptr.vmem [resolvable:$true] %s47_s10 }
  0x1a   :  { %s991_s11 = scalar_lea.vmem %s48_s10, 4096  ;;  %p996_p11 = scmp.lt.s32.totalorder %s48_s10, %s48_s10 }
  0x1b   :  { %p992_p10 = scmp.ne.s32.totalorder %s48_s10, %s991_s11  ;;  %p997_p12 = scmp.lt.s32.totalorder %s991_s11, %s991_s11 }
  0x1d   :  { %p998_p13 = por %p997_p12, %p996_p11 }
  0x1f   :  { %p999_p0 = pnand %p998_p13, %p992_p10 }
  0x21   :  { %1002 = shalt.err (!%p999_p0)
}
  0x22   :  { %53 = dma.hbm_to_vmem [thread:$0]  %s1472_s3, 4096, %s48_s10, [#allocation6], %s1073_s26, %s1073_s26, %s1074_s27  }
  0x23   :  { %1063 = dma.done.wait [#allocation3], 4096  }
  0x24   :  { %1064 = vsyncadd [#allocation3], 4294963200 }
  0x25   :  { %1065 = dma.done.wait [#allocation6], 6144  }
  0x26   :  { %1066 = vsyncadd [#allocation6], 4294961152  ;;  %v1076_v0 = vmov 0   ;;  %v855_v1 = vld [vmem:[#allocation5 + $0x74] ss:$8 sps:$4 sm:$0xff]   ;;  %v64_v17 = vld [vmem:[#allocation2] sm:$0xff] }
  0x27   :  { %252 = vmatprep.mubr.bf16.mxu0 %v1076_v0  ;;  %332 = vmatprep.mubr.bf16.mxu1 %v1076_v0  ;;  %v857_v2 = vld [vmem:[#allocation5 + $0x70] ss:$8 sps:$4 sm:$0xff]   ;;  %v858_v3 = vld [vmem:[#allocation5 + $0x64] ss:$8 sps:$4 sm:$0xff]   ;;  %v860_v4 = vld [vmem:[#allocation5 + $0x60] ss:$8 sps:$4 sm:$0xff]  }
  0x28   :  { %220 = vmatprep.subr.bf16.mxu0 %v855_v1  ;;  %830 = vmatprep.subr.bf16.mxu1 %v855_v1  ;;  %v861_v5 = vld [vmem:[#allocation5 + $0x54] ss:$8 sps:$4 sm:$0xff]   ;;  %v863_v6 = vld [vmem:[#allocation5 + $0x50] ss:$8 sps:$4 sm:$0xff]   ;;  %v864_v7 = vld [vmem:[#allocation5 + $0x44] ss:$8 sps:$4 sm:$0xff]  }
  0x29   :  { %221 = vmatpush1.bf16.msra.mxu0 %v857_v2  ;;  %838 = vmatpush1.bf16.msra.mxu1 %v857_v2  ;;  %v866_v8 = vld [vmem:[#allocation5 + $0x40] ss:$8 sps:$4 sm:$0xff]   ;;  %v867_v9 = vld [vmem:[#allocation5 + $0x34] ss:$8 sps:$4 sm:$0xff]   ;;  %v869_v10 = vld [vmem:[#allocation5 + $0x30] ss:$8 sps:$4 sm:$0xff]   ;;  %v130_v2 = vlaneseq }
  0x2a   :  { %222 = vmatprep.subr.bf16.mxu0 %v858_v3  ;;  %831 = vmatprep.subr.bf16.mxu1 %v858_v3  ;;  %v870_v11 = vld [vmem:[#allocation5 + $0x24] ss:$8 sps:$4 sm:$0xff]   ;;  %v872_v12 = vld [vmem:[#allocation5 + $0x20] ss:$8 sps:$4 sm:$0xff]   ;;  %v873_v13 = vld [vmem:[#allocation5 + $0x14] ss:$8 sps:$4 sm:$0xff]  }
  0x2b   :  { %v875_v14 = vld [vmem:[#allocation5 + $0x10] ss:$8 sps:$4 sm:$0xff]   ;;  %v876_v15 = vld [vmem:[#allocation5 + $0x4] ss:$8 sps:$4 sm:$0xff]   ;;  %v878_v16 = vld [vmem:[#allocation5] ss:$8 sps:$4 sm:$0xff]  }
  0x2c   :  { %v65_v18 = vld [vmem:[#allocation2 + $0x8] sm:$0xff]  ;;  %v80_v19 = vld [vmem:[#allocation2 + $0x80] sm:$0xff]  ;;  %v66_v23 = vld [vmem:[#allocation2 + $0x10] sm:$0xff]  ;;  %v131_v3 = vshrl.u32 %v130_v2, 7  ;;  %s1078_s14 = smov [#allocation11]  }
  0x2d   :  { %223 = vmatpush1.bf16.msra.mxu0 %v860_v4  ;;  %839 = vmatpush1.bf16.msra.mxu1 %v860_v4  ;;  %v81_v20 = vld [vmem:[#allocation2 + $0x88] sm:$0xff]  ;;  %v96_v21 = vpack.c.bf16 %v65_v18, %v64_v17  ;;  %v67_v24 = vld [vmem:[#allocation2 + $0x18] sm:$0xff]  ;;  %v82_v25 = vld [vmem:[#allocation2 + $0x90] sm:$0xff]  ;;  %s794_s15 = sshll.u32 %s1078_s14, 4  ;;  %s1424_s15 = int_to_ptr.vmem [resolvable:$true] %s794_s15 }
  0x2e   :  { %224 = vmatprep.subr.bf16.mxu0 %v861_v5  ;;  %832 = vmatprep.subr.bf16.mxu1 %v861_v5  ;;  %v104_v22 = vpack.c.bf16 %v81_v20, %v80_v19  ;;  %v83_v26 = vld [vmem:[#allocation2 + $0x98] sm:$0xff]  ;;  %v97_v27 = vpack.c.bf16 %v67_v24, %v66_v23  ;;  %v68_v29 = vld [vmem:[#allocation2 + $0x20] sm:$0xff]  ;;  %v69_v30 = vld [vmem:[#allocation2 + $0x28] sm:$0xff]  ;;  %v132_v4 = vsub.s32 0, %v131_v3 }
  0x2f   :  { %v105_v28 = vpack.c.bf16 %v83_v26, %v82_v25  ;;  %v84_v31 = vld [vmem:[#allocation2 + $0xa0] sm:$0xff]  ;;  %v85_v32 = vld [vmem:[#allocation2 + $0xa8] sm:$0xff]  ;;  %v98_v33 = vpack.c.bf16 %v69_v30, %v68_v29  ;;  %v70_v35 = vld [vmem:[#allocation2 + $0x30] sm:$0xff] }
  0x30   :  { %v106_v34 = vpack.c.bf16 %v85_v32, %v84_v31  ;;  %v71_v36 = vld [vmem:[#allocation2 + $0x38] sm:$0xff]  ;;  %v86_v37 = vld [vmem:[#allocation2 + $0xb0] sm:$0xff]  ;;  %v72_v41 = vld [vmem:[#allocation2 + $0x40] sm:$0xff] }
  0x31   :  { %225 = vmatpush1.bf16.msra.mxu0 %v863_v6  ;;  %840 = vmatpush1.bf16.msra.mxu1 %v863_v6  ;;  %v87_v38 = vld [vmem:[#allocation2 + $0xb8] sm:$0xff]  ;;  %v99_v39 = vpack.c.bf16 %v71_v36, %v70_v35  ;;  %v73_v42 = vld [vmem:[#allocation2 + $0x48] sm:$0xff]  ;;  %v88_v43 = vld [vmem:[#allocation2 + $0xc0] sm:$0xff]  ;;  %v136_v6 = vsub.s32 1, %v131_v3 }
  0x32   :  { %226 = vmatprep.subr.bf16.mxu0 %v864_v7  ;;  %833 = vmatprep.subr.bf16.mxu1 %v864_v7  ;;  %v107_v40 = vpack.c.bf16 %v87_v38, %v86_v37  ;;  %v89_v44 = vld [vmem:[#allocation2 + $0xc8] sm:$0xff]  ;;  %v100_v45 = vpack.c.bf16 %v73_v42, %v72_v41  ;;  %v74_v47 = vld [vmem:[#allocation2 + $0x50] sm:$0xff]  ;;  %v75_v48 = vld [vmem:[#allocation2 + $0x58] sm:$0xff] }
  0x33   :  { %v108_v46 = vpack.c.bf16 %v89_v44, %v88_v43  ;;  %v90_v49 = vld [vmem:[#allocation2 + $0xd0] sm:$0xff]  ;;  %v91_v50 = vld [vmem:[#allocation2 + $0xd8] sm:$0xff]  ;;  %v101_v51 = vpack.c.bf16 %v75_v48, %v74_v47  ;;  %v76_v53 = vld [vmem:[#allocation2 + $0x60] sm:$0xff] }
  0x34   :  { %v109_v52 = vpack.c.bf16 %v91_v50, %v90_v49  ;;  %v77_v54 = vld [vmem:[#allocation2 + $0x68] sm:$0xff]  ;;  %v92_v55 = vld [vmem:[#allocation2 + $0xe0] sm:$0xff]  ;;  %v78_v59 = vld [vmem:[#allocation2 + $0x70] sm:$0xff] }
  0x35   :  { %227 = vmatpush1.bf16.msra.mxu0 %v866_v8  ;;  %841 = vmatpush1.bf16.msra.mxu1 %v866_v8  ;;  %v93_v56 = vld [vmem:[#allocation2 + $0xe8] sm:$0xff]  ;;  %v102_v57 = vpack.c.bf16 %v77_v54, %v76_v53  ;;  %v79_v60 = vld [vmem:[#allocation2 + $0x78] sm:$0xff]  ;;  %v94_v61 = vld [vmem:[#allocation2 + $0xf0] sm:$0xff] }
  0x36   :  { %228 = vmatprep.subr.bf16.mxu0 %v867_v9  ;;  %834 = vmatprep.subr.bf16.mxu1 %v867_v9  ;;  %v110_v58 = vpack.c.bf16 %v93_v56, %v92_v55  ;;  %v95_v62 = vld [vmem:[#allocation2 + $0xf8] sm:$0xff]  ;;  %v103_v63 = vpack.c.bf16 %v79_v60, %v78_v59  ;;  %v128_v5 = vld [vmem:[%s1471_s2] sm:$0x3]  ;;  %s1077_s2 = smov [#allocation9]  }
  0x37   :  { %v111_v1 = vpack.c.bf16 %v95_v62, %v94_v61  ;;  %v1152_v7 = vrot.slane %v128_v5, %v132_v4  ;;  %v1154_v8 = vrot.slane %v128_v5, %v136_v6  ;;  %s782_s13 = sshll.u32 %s1077_s2, 4  ;;  %s783_s13 = int_to_ptr.vmem [resolvable:$true] %s782_s13 }
  0x38   :  { %s1003_s16 = scalar_lea.vmem %s783_s13, 4096  ;;  %p1008_p2 = scmp.lt.s32.totalorder %s783_s13, %s783_s13 }
  0x39   :  { %229 = vmatpush1.bf16.msra.mxu0 %v869_v10  ;;  %842 = vmatpush1.bf16.msra.mxu1 %v869_v10  ;;  %p1004_p1 = scmp.ne.s32.totalorder %s783_s13, %s1003_s16  ;;  %p1009_p3 = scmp.lt.s32.totalorder %s1003_s16, %s1003_s16 }
  0x3a   :  { %230 = vmatprep.subr.bf16.mxu0 %v870_v11  ;;  %835 = vmatprep.subr.bf16.mxu1 %v870_v11 }
  0x3b   :  { %p1010_p4 = por %p1009_p3, %p1008_p2 }
  0x3d   :  { %231 = vmatpush1.bf16.msra.mxu0 %v872_v12  ;;  %843 = vmatpush1.bf16.msra.mxu1 %v872_v12  ;;  %p1011_p5 = pnand %p1010_p4, %p1004_p1 }
  0x3e   :  { %232 = vmatprep.subr.bf16.mxu0 %v873_v13  ;;  %836 = vmatprep.subr.bf16.mxu1 %v873_v13 }
  0x41   :  { %233 = vmatpush1.bf16.msra.mxu0 %v875_v14  ;;  %844 = vmatpush1.bf16.msra.mxu1 %v875_v14 }
  0x42   :  { %234 = vmatprep.subr.bf16.mxu0 %v876_v15  ;;  %837 = vmatprep.subr.bf16.mxu1 %v876_v15 }
  0x45   :  { %235 = vmatpush1.bf16.msra.mxu0 %v878_v16  ;;  %845 = vmatpush1.bf16.msra.mxu1 %v878_v16 }
  0x48   :  { %253 = vmatmul.mubr.bf16.vlgmr.msra.gmra.mxu0 %v96_v21  ;;  %333 = vmatmul.mubr.bf16.vlgmr.msra.gmra.mxu1 %v104_v22 }
  0x49   :  { %262 = vmatprep.mubr.bf16.mxu0 %v1076_v0  ;;  %342 = vmatprep.mubr.bf16.mxu1 %v1076_v0 }
  0x50   :  { %263 = vmatmul.mubr.bf16.gmra.mxu0 %v97_v27  ;;  %343 = vmatmul.mubr.bf16.gmra.mxu1 %v105_v28 }
  0x51   :  { %272 = vmatprep.mubr.bf16.mxu0 %v1076_v0  ;;  %352 = vmatprep.mubr.bf16.mxu1 %v1076_v0 }
  0x58   :  { %273 = vmatmul.mubr.bf16.gmra.mxu0 %v98_v33  ;;  %353 = vmatmul.mubr.bf16.gmra.mxu1 %v106_v34 }
  0x59   :  { %282 = vmatprep.mubr.bf16.mxu0 %v1076_v0  ;;  %362 = vmatprep.mubr.bf16.mxu1 %v1076_v0 }
  0x60   :  { %283 = vmatmul.mubr.bf16.gmra.mxu0 %v99_v39  ;;  %363 = vmatmul.mubr.bf16.gmra.mxu1 %v107_v40 }
  0x61   :  { %292 = vmatprep.mubr.bf16.mxu0 %v1076_v0  ;;  %372 = vmatprep.mubr.bf16.mxu1 %v1076_v0 }
  0x68   :  { %293 = vmatmul.mubr.bf16.gmra.mxu0 %v100_v45  ;;  %373 = vmatmul.mubr.bf16.gmra.mxu1 %v108_v46 }
  0x69   :  { %302 = vmatprep.mubr.bf16.mxu0 %v1076_v0  ;;  %382 = vmatprep.mubr.bf16.mxu1 %v1076_v0 }
  0x70   :  { %303 = vmatmul.mubr.bf16.gmra.mxu0 %v101_v51  ;;  %383 = vmatmul.mubr.bf16.gmra.mxu1 %v109_v52 }
  0x71   :  { %312 = vmatprep.mubr.bf16.mxu0 %v1076_v0  ;;  %392 = vmatprep.mubr.bf16.mxu1 %v1076_v0 }
  0x78   :  { %313 = vmatmul.mubr.bf16.gmra.mxu0 %v102_v57  ;;  %393 = vmatmul.mubr.bf16.gmra.mxu1 %v110_v58 }
  0x79   :  { %322 = vmatprep.mubr.bf16.mxu0 %v1076_v0  ;;  %402 = vmatprep.mubr.bf16.mxu1 %v1076_v0 }
  0x80   :  { %323 = vmatmul.mubr.bf16.gmra.mxu0 %v103_v63  ;;  %403 = vmatmul.mubr.bf16.gmra.mxu1 %v111_v1 }
 0x108   :  { %v254_v0 = vpop.f32.mrf.mxu0  ;;  %v334_v9 = vpop.f32.mrf.mxu1 }
 0x109   :  { %v1157_v10 = vadd.f32 %v254_v0, %v1152_v7  ;;  %v1160_v11 = vadd.f32 %v334_v9, %v1152_v7 }
 0x10a   :  { %v256_v12 = vpop.f32.mrf.mxu0  ;;  %v336_v13 = vpop.f32.mrf.mxu1 }
 0x10b   :  { %v413_v14 = vmax.f32 %v1157_v10, 0.0  ;;  %v445_v15 = vmax.f32 %v1160_v11, 0.0  ;;  %v257_v16 = vadd.f32 %v256_v12, %v1154_v8  ;;  %v337_v17 = vadd.f32 %v336_v13, %v1154_v8 }
 0x10c   :  { %v258_v18 = vpop.f32.mrf.mxu0  ;;  %v338_v19 = vpop.f32.mrf.mxu1 }
 0x10d   :  { %701 = vst [vmem:[#allocation9] sm:$0xff] %v413_v14  ;;  %717 = vst [vmem:[#allocation9 + $0x80] sm:$0xff] %v445_v15  ;;  %v414_v20 = vmax.f32 %v257_v16, 0.0  ;;  %v446_v21 = vmax.f32 %v337_v17, 0.0  ;;  %v1171_v22 = vadd.f32 %v258_v18, %v1152_v7  ;;  %v1174_v23 = vadd.f32 %v338_v19, %v1152_v7 }
 0x10e   :  { %v260_v24 = vpop.f32.mrf.mxu0  ;;  %v340_v25 = vpop.f32.mrf.mxu1 }
 0x10f   :  { %v477_v26 = vmul.f32 0.5, %v414_v20  ;;  %733 = vst [vmem:[#allocation11] sm:$0xff] %v414_v20  ;;  %v493_v27 = vmul.f32 0.5, %v446_v21  ;;  %749 = vst [vmem:[#allocation11 + $0x80] sm:$0xff] %v446_v21  ;;  %v415_v28 = vmax.f32 %v1171_v22, 0.0  ;;  %v447_v29 = vmax.f32 %v1174_v23, 0.0 }
 0x110   :  { %v261_v30 = vadd.f32 %v260_v24, %v1154_v8  ;;  %v341_v31 = vadd.f32 %v340_v25, %v1154_v8  ;;  %v264_v32 = vpop.f32.mrf.mxu0  ;;  %v344_v33 = vpop.f32.mrf.mxu1 }
 0x111   :  { %v509_v34 = vmul.f32 1.442695, %v477_v26  ;;  %v541_v35 = vmul.f32 1.442695, %v493_v27  ;;  %702 = vst [vmem:[#allocation9 + $0x8] sm:$0xff] %v415_v28  ;;  %718 = vst [vmem:[#allocation9 + $0x88] sm:$0xff] %v447_v29  ;;  %v1185_v36 = vadd.f32 %v264_v32, %v1152_v7  ;;  %v1188_v37 = vadd.f32 %v344_v33, %v1152_v7 }
 0x112   :  { %v416_v38 = vmax.f32 %v261_v30, 0.0  ;;  %v448_v39 = vmax.f32 %v341_v31, 0.0  ;;  %v266_v40 = vpop.f32.mrf.mxu0  ;;  %v346_v41 = vpop.f32.mrf.mxu1  ;;  %v573_v32 = vld [vmem:[#allocation7] sm:$0xff] }
 0x113   :  { %879 = vpow2.f32 %v509_v34  ;;  %v417_v42 = vmax.f32 %v1185_v36, 0.0  ;;  %v449_v43 = vmax.f32 %v1188_v37, 0.0  ;;  %v267_v44 = vadd.f32 %v266_v40, %v1154_v8 }
 0x114   :  { %881 = vpow2.f32 %v541_v35  ;;  %v478_v45 = vmul.f32 0.5, %v416_v38  ;;  %734 = vst [vmem:[#allocation11 + $0x8] sm:$0xff] %v416_v38  ;;  %v494_v46 = vmul.f32 0.5, %v448_v39  ;;  %750 = vst [vmem:[#allocation11 + $0x88] sm:$0xff] %v448_v39  ;;  %v347_v47 = vadd.f32 %v346_v41, %v1154_v8  ;;  %v268_v48 = vpop.f32.mrf.mxu0  ;;  %v348_v49 = vpop.f32.mrf.mxu1  ;;  %v589_v39 = vld [vmem:[#allocation7 + $0x80] sm:$0xff] }
 0x115   :  { %703 = vst [vmem:[#allocation9 + $0x10] sm:$0xff] %v417_v42  ;;  %719 = vst [vmem:[#allocation9 + $0x90] sm:$0xff] %v449_v43  ;;  %v418_v50 = vmax.f32 %v267_v44, 0.0  ;;  %v1199_v51 = vadd.f32 %v268_v48, %v1152_v7  ;;  %v1202_v52 = vadd.f32 %v348_v49, %v1152_v7 }
 0x116   :  { %v511_v53 = vmul.f32 1.442695, %v478_v45  ;;  %v543_v54 = vmul.f32 1.442695, %v494_v46  ;;  %v450_v55 = vmax.f32 %v347_v47, 0.0  ;;  %v270_v56 = vpop.f32.mrf.mxu0  ;;  %v350_v57 = vpop.f32.mrf.mxu1 }
 0x117   :  { %v479_v58 = vmul.f32 0.5, %v418_v50  ;;  %735 = vst [vmem:[#allocation11 + $0x10] sm:$0xff] %v418_v50  ;;  %v419_v59 = vmax.f32 %v1199_v51, 0.0  ;;  %v451_v60 = vmax.f32 %v1202_v52, 0.0  ;;  %v271_v61 = vadd.f32 %v270_v56, %v1154_v8 }
 0x118   :  { %883 = vpow2.f32 %v511_v53  ;;  %v495_v62 = vmul.f32 0.5, %v450_v55  ;;  %751 = vst [vmem:[#allocation11 + $0x90] sm:$0xff] %v450_v55  ;;  %v351_v63 = vadd.f32 %v350_v57, %v1154_v8  ;;  %v274_v1 = vpop.f32.mrf.mxu0  ;;  %v354_v2 = vpop.f32.mrf.mxu1 }
 0x119   :  { %885 = vpow2.f32 %v543_v54  ;;  %v513_v3 = vmul.f32 1.442695, %v479_v58  ;;  %704 = vst [vmem:[#allocation9 + $0x18] sm:$0xff] %v419_v59  ;;  %720 = vst [vmem:[#allocation9 + $0x98] sm:$0xff] %v451_v60  ;;  %v420_v4 = vmax.f32 %v271_v61, 0.0  ;;  %v1213_v5 = vadd.f32 %v274_v1, %v1152_v7 }
 0x11a   :  { %v545_v6 = vmul.f32 1.442695, %v495_v62  ;;  %v452_v0 = vmax.f32 %v351_v63, 0.0  ;;  %v1216_v9 = vadd.f32 %v354_v2, %v1152_v7  ;;  %v276_v12 = vpop.f32.mrf.mxu0  ;;  %v356_v13 = vpop.f32.mrf.mxu1 }
 0x11b   :  { %887 = vpow2.f32 %v513_v3  ;;  %v480_v16 = vmul.f32 0.5, %v420_v4  ;;  %736 = vst [vmem:[#allocation11 + $0x18] sm:$0xff] %v420_v4  ;;  %v421_v17 = vmax.f32 %v1213_v5, 0.0  ;;  %v277_v18 = vadd.f32 %v276_v12, %v1154_v8  ;;  %v574_v4 = vld [vmem:[#allocation7 + $0x8] sm:$0xff] }
 0x11c   :  { %889 = vpow2.f32 %v545_v6  ;;  %v496_v19 = vmul.f32 0.5, %v452_v0  ;;  %752 = vst [vmem:[#allocation11 + $0x98] sm:$0xff] %v452_v0  ;;  %v453_v20 = vmax.f32 %v1216_v9, 0.0  ;;  %v357_v21 = vadd.f32 %v356_v13, %v1154_v8  ;;  %v278_v24 = vpop.f32.mrf.mxu0  ;;  %v358_v25 = vpop.f32.mrf.mxu1  ;;  %v590_v13 = vld [vmem:[#allocation7 + $0x88] sm:$0xff] }
 0x11d   :  { %v515_v26 = vmul.f32 1.442695, %v480_v16  ;;  %705 = vst [vmem:[#allocation9 + $0x20] sm:$0xff] %v421_v17  ;;  %v422_v27 = vmax.f32 %v277_v18, 0.0  ;;  %v1225_v30 = vadd.f32 %v278_v24, %v1152_v7  ;;  %v1228_v31 = vadd.f32 %v358_v25, %v1152_v7 }
 0x11e   :  { %v547_v33 = vmul.f32 1.442695, %v496_v19  ;;  %721 = vst [vmem:[#allocation9 + $0xa0] sm:$0xff] %v453_v20  ;;  %v454_v34 = vmax.f32 %v357_v21, 0.0  ;;  %v280_v35 = vpop.f32.mrf.mxu0  ;;  %v360_v38 = vpop.f32.mrf.mxu1 }
 0x11f   :  { %891 = vpow2.f32 %v515_v26  ;;  %v481_v40 = vmul.f32 0.5, %v422_v27  ;;  %737 = vst [vmem:[#allocation11 + $0x20] sm:$0xff] %v422_v27  ;;  %v423_v41 = vmax.f32 %v1225_v30, 0.0  ;;  %v455_v44 = vmax.f32 %v1228_v31, 0.0  ;;  %v575_v27 = vld [vmem:[#allocation7 + $0x10] sm:$0xff] }
 0x120   :  { %v880_v45 = vpop.eup %879  ;;  %893 = vpow2.f32 %v547_v33  ;;  %v497_v46 = vmul.f32 0.5, %v454_v34  ;;  %753 = vst [vmem:[#allocation11 + $0xa0] sm:$0xff] %v454_v34  ;;  %v281_v47 = vadd.f32 %v280_v35, %v1154_v8  ;;  %v361_v48 = vadd.f32 %v360_v38, %v1154_v8  ;;  %v284_v49 = vpop.f32.mrf.mxu0 }
 0x121   :  { %v364_v50 = vpop.f32.mrf.mxu1  ;;  %v882_v53 = vpop.eup %881  ;;  %v605_v54 = vmul.f32 %v880_v45, %v573_v32  ;;  %v517_v55 = vmul.f32 1.442695, %v481_v40  ;;  %706 = vst [vmem:[#allocation9 + $0x28] sm:$0xff] %v423_v41  ;;  %722 = vst [vmem:[#allocation9 + $0xa8] sm:$0xff] %v455_v44  ;;  %v1241_v56 = vadd.f32 %v284_v49, %v1152_v7 }
 0x122   :  { %v1244_v57 = vadd.f32 %v364_v50, %v1152_v7  ;;  %v621_v58 = vmul.f32 %v882_v53, %v589_v39  ;;  %v549_v61 = vmul.f32 1.442695, %v497_v46  ;;  %v424_v62 = vmax.f32 %v281_v47, 0.0  ;;  %v286_v1 = vpop.f32.mrf.mxu0  ;;  %v591_v39 = vld [vmem:[#allocation7 + $0x90] sm:$0xff] }
 0x123   :  { %v456_v63 = vmax.f32 %v361_v48, 0.0  ;;  %v366_v2 = vpop.f32.mrf.mxu1  ;;  %v637_v3 = vadd.f32 %v605_v54, %v413_v14  ;;  %895 = vpow2.f32 %v517_v55  ;;  %v425_v6 = vmax.f32 %v1241_v56, 0.0 }
 0x124   :  { %v457_v0 = vmax.f32 %v1244_v57, 0.0  ;;  %v653_v12 = vadd.f32 %v621_v58, %v445_v15  ;;  %897 = vpow2.f32 %v549_v61  ;;  %v482_v16 = vmul.f32 0.5, %v424_v62  ;;  %738 = vst [vmem:[#allocation11 + $0x28] sm:$0xff] %v424_v62  ;;  %v288_v19 = vpop.f32.mrf.mxu0 }
 0x125   :  { %v498_v18 = vmul.f32 0.5, %v456_v63  ;;  %754 = vst [vmem:[#allocation11 + $0xa8] sm:$0xff] %v456_v63  ;;  %v368_v21 = vpop.f32.mrf.mxu1  ;;  %v884_v24 = vpop.eup %883  ;;  %669 = vst [vmem:[#allocation8] sm:$0xff] %v637_v3  ;;  %v287_v10 = vadd.f32 %v286_v1, %v1154_v8  ;;  %v367_v11 = vadd.f32 %v366_v2, %v1154_v8  ;;  %v1259_v14 = vadd.f32 %v288_v19, %v1152_v7 }
 0x126   :  { %707 = vst [vmem:[#allocation9 + $0x30] sm:$0xff] %v425_v6  ;;  %723 = vst [vmem:[#allocation9 + $0xb0] sm:$0xff] %v457_v0  ;;  %v1262_v15 = vadd.f32 %v368_v21, %v1152_v7  ;;  %v886_v25 = vpop.eup %885  ;;  %v606_v26 = vmul.f32 %v884_v24, %v574_v4  ;;  %v519_v32 = vmul.f32 1.442695, %v482_v16  ;;  %v290_v34 = vpop.f32.mrf.mxu0  ;;  %v592_v4 = vld [vmem:[#allocation7 + $0x98] sm:$0xff] }
 0x127   :  { %685 = vst [vmem:[#allocation8 + $0x80] sm:$0xff] %v653_v12  ;;  %v551_v33 = vmul.f32 1.442695, %v498_v18  ;;  %v370_v35 = vpop.f32.mrf.mxu1  ;;  %v622_v38 = vmul.f32 %v886_v25, %v590_v13  ;;  %v426_v40 = vmax.f32 %v287_v10, 0.0  ;;  %v458_v45 = vmax.f32 %v367_v11, 0.0 }
 0x128   :  { %v427_v46 = vmax.f32 %v1259_v14, 0.0  ;;  %v888_v47 = vpop.eup %887  ;;  %v638_v48 = vadd.f32 %v606_v26, %v415_v28  ;;  %899 = vpow2.f32 %v519_v32  ;;  %v459_v49 = vmax.f32 %v1262_v15, 0.0  ;;  %v294_v53 = vpop.f32.mrf.mxu0  ;;  %v576_v28 = vld [vmem:[#allocation7 + $0x18] sm:$0xff] }
 0x129   :  { %v291_v50 = vadd.f32 %v290_v34, %v1154_v8  ;;  %v374_v54 = vpop.f32.mrf.mxu1  ;;  %v890_v55 = vpop.eup %889  ;;  %v654_v58 = vadd.f32 %v622_v38, %v447_v29  ;;  %v607_v61 = vmul.f32 %v888_v47, %v575_v27  ;;  %901 = vpow2.f32 %v551_v33  ;;  %739 = vst [vmem:[#allocation11 + $0x30] sm:$0xff] %v426_v40  ;;  %755 = vst [vmem:[#allocation11 + $0xb0] sm:$0xff] %v458_v45  ;;  %v577_v33 = vld [vmem:[#allocation7 + $0x20] sm:$0xff] }
 0x12a   :  { %v483_v62 = vmul.f32 0.5, %v426_v40  ;;  %708 = vst [vmem:[#allocation9 + $0x38] sm:$0xff] %v427_v46  ;;  %670 = vst [vmem:[#allocation8 + $0x8] sm:$0xff] %v638_v48  ;;  %v623_v22 = vmul.f32 %v890_v55, %v591_v39  ;;  %v499_v63 = vmul.f32 0.5, %v458_v45  ;;  %v371_v2 = vadd.f32 %v370_v35, %v1154_v8  ;;  %v296_v23 = vpop.f32.mrf.mxu0  ;;  %v593_v39 = vld [vmem:[#allocation7 + $0xa0] sm:$0xff] }
 0x12b   :  { %724 = vst [vmem:[#allocation9 + $0xb8] sm:$0xff] %v459_v49  ;;  %v428_v1 = vmax.f32 %v291_v50, 0.0  ;;  %v376_v29 = vpop.f32.mrf.mxu1  ;;  %686 = vst [vmem:[#allocation8 + $0x88] sm:$0xff] %v654_v58  ;;  %v639_v3 = vadd.f32 %v607_v61, %v417_v42  ;;  %v1279_v13 = vadd.f32 %v294_v53, %v1152_v7  ;;  %v1282_v16 = vadd.f32 %v374_v54, %v1152_v7 }
 0x12c   :  { %v521_v12 = vmul.f32 1.442695, %v483_v62  ;;  %v892_v18 = vpop.eup %891  ;;  %v655_v19 = vadd.f32 %v623_v22, %v449_v43  ;;  %v553_v21 = vmul.f32 1.442695, %v499_v63  ;;  %v460_v10 = vmax.f32 %v371_v2, 0.0  ;;  %v298_v11 = vpop.f32.mrf.mxu0 }
 0x12d   :  { %v484_v24 = vmul.f32 0.5, %v428_v1  ;;  %740 = vst [vmem:[#allocation11 + $0x38] sm:$0xff] %v428_v1  ;;  %v378_v25 = vpop.f32.mrf.mxu1  ;;  %v894_v36 = vpop.eup %893  ;;  %671 = vst [vmem:[#allocation8 + $0x10] sm:$0xff] %v639_v3  ;;  %v608_v42 = vmul.f32 %v892_v18, %v576_v28  ;;  %v429_v26 = vmax.f32 %v1279_v13, 0.0  ;;  %v461_v27 = vmax.f32 %v1282_v16, 0.0  ;;  %v594_v18 = vld [vmem:[#allocation7 + $0xa8] sm:$0xff] }
 0x12e   :  { %903 = vpow2.f32 %v521_v12  ;;  %687 = vst [vmem:[#allocation8 + $0x90] sm:$0xff] %v655_v19  ;;  %v624_v32 = vmul.f32 %v894_v36, %v592_v4  ;;  %v500_v43 = vmul.f32 0.5, %v460_v10  ;;  %756 = vst [vmem:[#allocation11 + $0xb8] sm:$0xff] %v460_v10  ;;  %v300_v34 = vpop.f32.mrf.mxu0  ;;  %v297_v40 = vadd.f32 %v296_v23, %v1154_v8  ;;  %v578_v23 = vld [vmem:[#allocation7 + $0x28] sm:$0xff] }
 0x12f   :  { %905 = vpow2.f32 %v553_v21  ;;  %v523_v37 = vmul.f32 1.442695, %v484_v24  ;;  %v380_v35 = vpop.f32.mrf.mxu1  ;;  %v640_v38 = vadd.f32 %v608_v42, %v419_v59  ;;  %709 = vst [vmem:[#allocation9 + $0x40] sm:$0xff] %v429_v26  ;;  %725 = vst [vmem:[#allocation9 + $0xc0] sm:$0xff] %v461_v27  ;;  %v377_v45 = vadd.f32 %v376_v29, %v1154_v8 }
 0x130   :  { %v1297_v47 = vadd.f32 %v298_v11, %v1152_v7  ;;  %v896_v48 = vpop.eup %895  ;;  %v656_v50 = vadd.f32 %v624_v32, %v451_v60  ;;  %v555_v51 = vmul.f32 1.442695, %v500_v43  ;;  %v1302_v59 = vadd.f32 %v378_v25, %v1152_v7  ;;  %v304_v53 = vpop.f32.mrf.mxu0 }
 0x131   :  { %907 = vpow2.f32 %v523_v37  ;;  %v384_v54 = vpop.f32.mrf.mxu1  ;;  %v898_v55 = vpop.eup %897  ;;  %672 = vst [vmem:[#allocation8 + $0x18] sm:$0xff] %v640_v38  ;;  %v609_v58 = vmul.f32 %v896_v48, %v577_v33  ;;  %v430_v61 = vmax.f32 %v297_v40, 0.0  ;;  %v462_v62 = vmax.f32 %v377_v45, 0.0  ;;  %v579_v45 = vld [vmem:[#allocation7 + $0x30] sm:$0xff] }
 0x132   :  { %v431_v22 = vmax.f32 %v1297_v47, 0.0  ;;  %688 = vst [vmem:[#allocation8 + $0x98] sm:$0xff] %v656_v50  ;;  %v625_v28 = vmul.f32 %v898_v55, %v593_v39  ;;  %909 = vpow2.f32 %v555_v51  ;;  %v463_v52 = vmax.f32 %v1302_v59, 0.0  ;;  %v306_v63 = vpop.f32.mrf.mxu0  ;;  %v595_v55 = vld [vmem:[#allocation7 + $0xb0] sm:$0xff] }
 0x133   :  { %v301_v60 = vadd.f32 %v300_v34, %v1154_v8  ;;  %v386_v1 = vpop.f32.mrf.mxu1  ;;  %v641_v2 = vadd.f32 %v609_v58, %v421_v17  ;;  %v485_v29 = vmul.f32 0.5, %v430_v61  ;;  %741 = vst [vmem:[#allocation11 + $0x40] sm:$0xff] %v430_v61  ;;  %v501_v3 = vmul.f32 0.5, %v462_v62  ;;  %757 = vst [vmem:[#allocation11 + $0xc0] sm:$0xff] %v462_v62 }
 0x134   :  { %710 = vst [vmem:[#allocation9 + $0x48] sm:$0xff] %v431_v22  ;;  %v381_v4 = vadd.f32 %v380_v35, %v1154_v8  ;;  %v657_v12 = vadd.f32 %v625_v28, %v453_v20  ;;  %726 = vst [vmem:[#allocation9 + $0xc8] sm:$0xff] %v463_v52  ;;  %v1317_v5 = vadd.f32 %v304_v53, %v1152_v7  ;;  %v308_v21 = vpop.f32.mrf.mxu0 }
 0x135   :  { %v432_v19 = vmax.f32 %v301_v60, 0.0  ;;  %v1320_v17 = vadd.f32 %v384_v54, %v1152_v7  ;;  %v388_v24 = vpop.f32.mrf.mxu1  ;;  %v900_v10 = vpop.eup %899  ;;  %673 = vst [vmem:[#allocation8 + $0x20] sm:$0xff] %v641_v2  ;;  %v525_v11 = vmul.f32 1.442695, %v485_v29  ;;  %v557_v25 = vmul.f32 1.442695, %v501_v3 }
 0x136   :  { %v464_v36 = vmax.f32 %v381_v4, 0.0  ;;  %v307_v9 = vadd.f32 %v306_v63, %v1154_v8  ;;  %v902_v20 = vpop.eup %901  ;;  %689 = vst [vmem:[#allocation8 + $0xa0] sm:$0xff] %v657_v12  ;;  %v610_v42 = vmul.f32 %v900_v10, %v578_v23  ;;  %v433_v33 = vmax.f32 %v1317_v5, 0.0  ;;  %v310_v43 = vpop.f32.mrf.mxu0  ;;  %v580_v2 = vld [vmem:[#allocation7 + $0x38] sm:$0xff] }
 0x137   :  { %v486_v32 = vmul.f32 0.5, %v432_v19  ;;  %742 = vst [vmem:[#allocation11 + $0x48] sm:$0xff] %v432_v19  ;;  %v465_v37 = vmax.f32 %v1320_v17, 0.0  ;;  %v390_v34 = vpop.f32.mrf.mxu1  ;;  %v626_v35 = vmul.f32 %v902_v20, %v594_v18  ;;  %911 = vpow2.f32 %v525_v11  ;;  %v596_v11 = vld [vmem:[#allocation7 + $0xb8] sm:$0xff] }
 0x138   :  { %v502_v38 = vmul.f32 0.5, %v464_v36  ;;  %758 = vst [vmem:[#allocation11 + $0xc8] sm:$0xff] %v464_v36  ;;  %v434_v39 = vmax.f32 %v307_v9, 0.0  ;;  %v642_v40 = vadd.f32 %v610_v42, %v423_v41  ;;  %913 = vpow2.f32 %v557_v25  ;;  %711 = vst [vmem:[#allocation9 + $0x50] sm:$0xff] %v433_v33  ;;  %v314_v51 = vpop.f32.mrf.mxu0 }
 0x139   :  { %v527_v48 = vmul.f32 1.442695, %v486_v32  ;;  %727 = vst [vmem:[#allocation9 + $0xd0] sm:$0xff] %v465_v37  ;;  %v387_v50 = vadd.f32 %v386_v1, %v1154_v8  ;;  %v394_v53 = vpop.f32.mrf.mxu1  ;;  %v658_v54 = vadd.f32 %v626_v35, %v455_v44  ;;  %v1335_v41 = vadd.f32 %v308_v21, %v1152_v7 }
 0x13a   :  { %v559_v58 = vmul.f32 1.442695, %v502_v38  ;;  %v487_v30 = vmul.f32 0.5, %v434_v39  ;;  %743 = vst [vmem:[#allocation11 + $0x50] sm:$0xff] %v434_v39  ;;  %674 = vst [vmem:[#allocation8 + $0x28] sm:$0xff] %v642_v40  ;;  %v1338_v28 = vadd.f32 %v388_v24, %v1152_v7  ;;  %v311_v60 = vadd.f32 %v310_v43, %v1154_v8  ;;  %v316_v63 = vpop.f32.mrf.mxu0 }
 0x13b   :  { %v904_v61 = vpop.eup %903  ;;  %915 = vpow2.f32 %v527_v48  ;;  %v466_v62 = vmax.f32 %v387_v50, 0.0  ;;  %v396_v1 = vpop.f32.mrf.mxu1  ;;  %690 = vst [vmem:[#allocation8 + $0xa8] sm:$0xff] %v658_v54  ;;  %v435_v29 = vmax.f32 %v1335_v41, 0.0  ;;  %v391_v25 = vadd.f32 %v390_v34, %v1154_v8 }
 0x13c   :  { %v906_v31 = vpop.eup %905  ;;  %v611_v44 = vmul.f32 %v904_v61, %v579_v45  ;;  %917 = vpow2.f32 %v559_v58  ;;  %v529_v23 = vmul.f32 1.442695, %v487_v30  ;;  %v467_v12 = vmax.f32 %v1338_v28, 0.0  ;;  %v318_v19 = vpop.f32.mrf.mxu0  ;;  %v597_v61 = vld [vmem:[#allocation7 + $0xc0] sm:$0xff] }
 0x13d   :  { %v627_v3 = vmul.f32 %v906_v31, %v595_v55  ;;  %v503_v4 = vmul.f32 0.5, %v466_v62  ;;  %759 = vst [vmem:[#allocation11 + $0xd0] sm:$0xff] %v466_v62  ;;  %v436_v18 = vmax.f32 %v311_v60, 0.0  ;;  %v398_v21 = vpop.f32.mrf.mxu1  ;;  %712 = vst [vmem:[#allocation9 + $0x58] sm:$0xff] %v435_v29  ;;  %v1349_v36 = vadd.f32 %v314_v51, %v1152_v7 }
 0x13e   :  { %v908_v24 = vpop.eup %907  ;;  %v643_v10 = vadd.f32 %v611_v44, %v425_v6  ;;  %919 = vpow2.f32 %v529_v23  ;;  %728 = vst [vmem:[#allocation9 + $0xd8] sm:$0xff] %v467_v12  ;;  %v320_v6 = vpop.f32.mrf.mxu0  ;;  %v468_v35 = vmax.f32 %v391_v25, 0.0  ;;  %v1357_v38 = vadd.f32 %v394_v53, %v1152_v7 }
 0x13f   :  { %v659_v9 = vadd.f32 %v627_v3, %v457_v0  ;;  %v612_v20 = vmul.f32 %v908_v24, %v580_v2  ;;  %v561_v42 = vmul.f32 1.442695, %v503_v4  ;;  %v488_v56 = vmul.f32 0.5, %v436_v18  ;;  %744 = vst [vmem:[#allocation11 + $0x58] sm:$0xff] %v436_v18  ;;  %v400_v32 = vpop.f32.mrf.mxu1  ;;  %v910_v43 = vpop.eup %909  ;;  %v582_v18 = vld [vmem:[#allocation7 + $0x48] sm:$0xff] }
 0x140   :  { %675 = vst [vmem:[#allocation8 + $0x30] sm:$0xff] %v643_v10  ;;  %v437_v34 = vmax.f32 %v1349_v36, 0.0  ;;  %v317_v57 = vadd.f32 %v316_v63, %v1154_v8  ;;  %v628_v39 = vmul.f32 %v910_v43, %v596_v11  ;;  %v324_v45 = vpop.f32.mrf.mxu0  ;;  %v504_v50 = vmul.f32 0.5, %v468_v35  ;;  %760 = vst [vmem:[#allocation11 + $0xd8] sm:$0xff] %v468_v35  ;;  %v598_v11 = vld [vmem:[#allocation7 + $0xc8] sm:$0xff] }
 0x141   :  { %691 = vst [vmem:[#allocation8 + $0xb0] sm:$0xff] %v659_v9  ;;  %v644_v0 = vadd.f32 %v612_v20, %v427_v46  ;;  %921 = vpow2.f32 %v561_v42  ;;  %v531_v40 = vmul.f32 1.442695, %v488_v56  ;;  %v404_v48 = vpop.f32.mrf.mxu1  ;;  %v469_v51 = vmax.f32 %v1357_v38, 0.0  ;;  %v581_v46 = vld [vmem:[#allocation7 + $0x40] sm:$0xff] }
 0x142   :  { %713 = vst [vmem:[#allocation9 + $0x60] sm:$0xff] %v437_v34  ;;  %v438_v53 = vmax.f32 %v317_v57, 0.0  ;;  %v397_v54 = vadd.f32 %v396_v1, %v1154_v8  ;;  %v660_v14 = vadd.f32 %v628_v39, %v459_v49  ;;  %v1369_v55 = vadd.f32 %v318_v19, %v1152_v7  ;;  %v326_v30 = vpop.f32.mrf.mxu0 }
 0x143   :  { %676 = vst [vmem:[#allocation8 + $0x38] sm:$0xff] %v644_v0  ;;  %923 = vpow2.f32 %v531_v40  ;;  %v1372_v58 = vadd.f32 %v398_v21, %v1152_v7  ;;  %v563_v62 = vmul.f32 1.442695, %v504_v50  ;;  %729 = vst [vmem:[#allocation9 + $0xe0] sm:$0xff] %v469_v51  ;;  %v321_v15 = vadd.f32 %v320_v6, %v1154_v8  ;;  %v406_v23 = vpop.f32.mrf.mxu1  ;;  %v583_v0 = vld [vmem:[#allocation7 + $0x50] sm:$0xff] }
 0x144   :  { %v489_v60 = vmul.f32 0.5, %v438_v53  ;;  %745 = vst [vmem:[#allocation11 + $0x60] sm:$0xff] %v438_v53  ;;  %v470_v63 = vmax.f32 %v397_v54, 0.0  ;;  %v912_v49 = vpop.eup %911  ;;  %692 = vst [vmem:[#allocation8 + $0xb8] sm:$0xff] %v660_v14  ;;  %v439_v1 = vmax.f32 %v1369_v55, 0.0  ;;  %v401_v44 = vadd.f32 %v400_v32, %v1154_v8  ;;  %v328_v24 = vpop.f32.mrf.mxu0 }
 0x145   :  { %v471_v31 = vmax.f32 %v1372_v58, 0.0  ;;  %v1381_v2 = vadd.f32 %v324_v45, %v1152_v7  ;;  %v914_v3 = vpop.eup %913  ;;  %v613_v4 = vmul.f32 %v912_v49, %v581_v46  ;;  %925 = vpow2.f32 %v563_v62  ;;  %v408_v13 = vpop.f32.mrf.mxu1  ;;  %v599_v62 = vld [vmem:[#allocation7 + $0xd0] sm:$0xff]  ;;  %v584_v49 = vld [vmem:[#allocation7 + $0x58] sm:$0xff] }
 0x146   :  { %v533_v19 = vmul.f32 1.442695, %v489_v60  ;;  %v505_v21 = vmul.f32 0.5, %v470_v63  ;;  %761 = vst [vmem:[#allocation11 + $0xe0] sm:$0xff] %v470_v63  ;;  %v629_v10 = vmul.f32 %v914_v3, %v597_v61  ;;  %714 = vst [vmem:[#allocation9 + $0x68] sm:$0xff] %v439_v1  ;;  %v440_v25 = vmax.f32 %v321_v15, 0.0  ;;  %v330_v50 = vpop.f32.mrf.mxu0 }
 0x147   :  { %730 = vst [vmem:[#allocation9 + $0xe8] sm:$0xff] %v471_v31  ;;  %v472_v9 = vmax.f32 %v401_v44, 0.0  ;;  %v441_v20 = vmax.f32 %v1381_v2, 0.0  ;;  %v645_v56 = vadd.f32 %v613_v4, %v429_v26  ;;  %v1391_v32 = vadd.f32 %v404_v48, %v1152_v7 }
 0x148   :  { %v916_v42 = vpop.eup %915  ;;  %927 = vpow2.f32 %v533_v19  ;;  %v565_v6 = vmul.f32 1.442695, %v505_v21  ;;  %v661_v35 = vadd.f32 %v629_v10, %v461_v27  ;;  %v490_v39 = vmul.f32 0.5, %v440_v25  ;;  %746 = vst [vmem:[#allocation11 + $0x68] sm:$0xff] %v440_v25  ;;  %v600_v10 = vld [vmem:[#allocation7 + $0xd8] sm:$0xff] }
 0x149   :  { %v918_v43 = vpop.eup %917  ;;  %v614_v57 = vmul.f32 %v916_v42, %v582_v18  ;;  %v506_v40 = vmul.f32 0.5, %v472_v9  ;;  %762 = vst [vmem:[#allocation11 + $0xe8] sm:$0xff] %v472_v9  ;;  %715 = vst [vmem:[#allocation9 + $0x70] sm:$0xff] %v441_v20  ;;  %v473_v45 = vmax.f32 %v1391_v32, 0.0  ;;  %v327_v48 = vadd.f32 %v326_v30, %v1154_v8 }
 0x14a   :  { %677 = vst [vmem:[#allocation8 + $0x40] sm:$0xff] %v645_v56  ;;  %v630_v26 = vmul.f32 %v918_v43, %v598_v11  ;;  %929 = vpow2.f32 %v565_v6  ;;  %693 = vst [vmem:[#allocation8 + $0xc0] sm:$0xff] %v661_v35  ;;  %v535_v53 = vmul.f32 1.442695, %v490_v39  ;;  %v407_v14 = vadd.f32 %v406_v23, %v1154_v8 }
 0x14b   :  { %v920_v16 = vpop.eup %919  ;;  %v646_v27 = vadd.f32 %v614_v57, %v431_v22  ;;  %v567_v54 = vmul.f32 1.442695, %v506_v40  ;;  %731 = vst [vmem:[#allocation9 + $0xf0] sm:$0xff] %v473_v45  ;;  %v442_v60 = vmax.f32 %v327_v48, 0.0  ;;  %v1407_v30 = vadd.f32 %v328_v24, %v1152_v7 }
 0x14c   :  { %v662_v46 = vadd.f32 %v630_v26, %v463_v52  ;;  %v615_v61 = vmul.f32 %v920_v16, %v583_v0  ;;  %931 = vpow2.f32 %v535_v53  ;;  %v474_v47 = vmax.f32 %v407_v14, 0.0  ;;  %v410_v52 = vpop.f32.mrf.mxu1 }
 0x14d   :  { %678 = vst [vmem:[#allocation8 + $0x48] sm:$0xff] %v646_v27  ;;  %v1410_v22 = vadd.f32 %v408_v13, %v1152_v7  ;;  %v331_v59 = vadd.f32 %v330_v50, %v1154_v8  ;;  %933 = vpow2.f32 %v567_v54  ;;  %v491_v44 = vmul.f32 0.5, %v442_v60  ;;  %747 = vst [vmem:[#allocation11 + $0x70] sm:$0xff] %v442_v60 }
 0x14e   :  { %v922_v63 = vpop.eup %921  ;;  %694 = vst [vmem:[#allocation8 + $0xc8] sm:$0xff] %v662_v46  ;;  %v647_v15 = vadd.f32 %v615_v61, %v433_v33  ;;  %v443_v23 = vmax.f32 %v1407_v30, 0.0  ;;  %v507_v4 = vmul.f32 0.5, %v474_v47  ;;  %763 = vst [vmem:[#allocation11 + $0xf0] sm:$0xff] %v474_v47  ;;  %v411_v5 = vadd.f32 %v410_v52, %v1154_v8 }
 0x14f   :  { %v631_v3 = vmul.f32 %v922_v63, %v599_v62  ;;  %v475_v7 = vmax.f32 %v1410_v22, 0.0  ;;  %v444_v18 = vmax.f32 %v331_v59, 0.0  ;;  %v537_v21 = vmul.f32 1.442695, %v491_v44 }
 0x150   :  { %v924_v19 = vpop.eup %923  ;;  %679 = vst [vmem:[#allocation8 + $0x50] sm:$0xff] %v647_v15  ;;  %716 = vst [vmem:[#allocation9 + $0x78] sm:$0xff] %v443_v23  ;;  %v569_v11 = vmul.f32 1.442695, %v507_v4  ;;  %v476_v9 = vmax.f32 %v411_v5, 0.0 }
 0x151   :  { %v663_v33 = vadd.f32 %v631_v3, %v465_v37  ;;  %v616_v24 = vmul.f32 %v924_v19, %v584_v49  ;;  %732 = vst [vmem:[#allocation9 + $0xf8] sm:$0xff] %v475_v7  ;;  %v492_v25 = vmul.f32 0.5, %v444_v18  ;;  %748 = vst [vmem:[#allocation11 + $0x78] sm:$0xff] %v444_v18  ;;  %935 = vpow2.f32 %v537_v21 }
 0x152   :  { %1014 = shalt.err (!%p1011_p5)
}
 0x153   :  { %788 = dma.vmem_to_hbm [thread:$0]  %s783_s13, 4096, %s1474_s5, [#allocation10], %s1073_s26, %s1073_s26, %s1074_s27   ;;  %v926_v8 = vpop.eup %925  ;;  %695 = vst [vmem:[#allocation8 + $0xd0] sm:$0xff] %v663_v33  ;;  %v648_v17 = vadd.f32 %v616_v24, %v435_v29  ;;  %v585_v37 = vld [vmem:[#allocation7 + $0x60] sm:$0xff]  ;;  %937 = vpow2.f32 %v569_v11  ;;  %v539_v42 = vmul.f32 1.442695, %v492_v25 }
 0x154   :  { %v632_v56 = vmul.f32 %v926_v8, %v600_v10  ;;  %v508_v6 = vmul.f32 0.5, %v476_v9  ;;  %764 = vst [vmem:[#allocation11 + $0xf8] sm:$0xff] %v476_v9  ;;  %v601_v35 = vld [vmem:[#allocation7 + $0xe0] sm:$0xff]  ;;  %s1023_s19 = scalar_lea.vmem %s1424_s15, 4096  ;;  %p1028_p7 = scmp.lt.s32.totalorder %s1424_s15, %s1424_s15 }
 0x155   :  { %v928_v43 = vpop.eup %927  ;;  %680 = vst [vmem:[#allocation8 + $0x58] sm:$0xff] %v648_v17  ;;  %939 = vpow2.f32 %v539_v42  ;;  %p1024_p6 = scmp.ne.s32.totalorder %s1424_s15, %s1023_s19  ;;  %p1029_p8 = scmp.lt.s32.totalorder %s1023_s19, %s1023_s19 }
 0x157   :  { %p1030_p9 = por %p1029_p8, %p1028_p7 }
 0x159   :  { %p1031_p10 = pnand %p1030_p9, %p1024_p6 }
 0x15b   :  { %1034 = shalt.err (!%p1031_p10)
}
 0x15c   :  { %800 = dma.vmem_to_hbm [thread:$0]  %s1424_s15, 4096, %s1475_s6, [#allocation10], %s1073_s26, %s1073_s26, %s1074_s27   ;;  %v664_v41 = vadd.f32 %v632_v56, %v467_v12  ;;  %v617_v29 = vmul.f32 %v928_v43, %v585_v37  ;;  %v571_v57 = vmul.f32 1.442695, %v508_v6  ;;  %v930_v0 = vpop.eup %929  ;;  %v586_v13 = vld [vmem:[#allocation7 + $0x68] sm:$0xff]  ;;  %v587_v53 = vld [vmem:[#allocation7 + $0x70] sm:$0xff] }
 0x15d   :  { %v633_v40 = vmul.f32 %v930_v0, %v601_v35  ;;  %v602_v26 = vld [vmem:[#allocation7 + $0xe8] sm:$0xff]  ;;  %v932_v48 = vpop.eup %931  ;;  %v588_v61 = vld [vmem:[#allocation7 + $0x78] sm:$0xff]  ;;  %s1079_s6 = smov [#allocation8]  }
 0x15e   :  { %696 = vst [vmem:[#allocation8 + $0xd8] sm:$0xff] %v664_v41  ;;  %v649_v39 = vadd.f32 %v617_v29, %v437_v34  ;;  %941 = vpow2.f32 %v571_v57  ;;  %v934_v16 = vpop.eup %933  ;;  %v618_v27 = vmul.f32 %v932_v48, %v586_v13  ;;  %v603_v34 = vld [vmem:[#allocation7 + $0xf0] sm:$0xff]  ;;  %v604_v60 = vld [vmem:[#allocation7 + $0xf8] sm:$0xff]  ;;  %s770_s21 = sshll.u32 %s1079_s6, 4  ;;  %s771_s21 = int_to_ptr.vmem [resolvable:$true] %s770_s21 }
 0x15f   :  { %v665_v50 = vadd.f32 %v633_v40, %v469_v51  ;;  %v634_v28 = vmul.f32 %v934_v16, %v602_v26  ;;  %v936_v54 = vpop.eup %935  ;;  %s1043_s22 = scalar_lea.vmem %s771_s21, 4096  ;;  %p1048_p12 = scmp.lt.s32.totalorder %s771_s21, %s771_s21 }
 0x160   :  { %681 = vst [vmem:[#allocation8 + $0x60] sm:$0xff] %v649_v39  ;;  %v650_v12 = vadd.f32 %v618_v27, %v439_v1  ;;  %v938_v14 = vpop.eup %937  ;;  %v619_v46 = vmul.f32 %v936_v54, %v587_v53  ;;  %p1044_p11 = scmp.ne.s32.totalorder %s771_s21, %s1043_s22  ;;  %p1049_p13 = scmp.lt.s32.totalorder %s1043_s22, %s1043_s22 }
 0x161   :  { %697 = vst [vmem:[#allocation8 + $0xe0] sm:$0xff] %v665_v50  ;;  %v666_v36 = vadd.f32 %v634_v28, %v471_v31  ;;  %v635_v38 = vmul.f32 %v938_v14, %v603_v34 }
 0x162   :  { %682 = vst [vmem:[#allocation8 + $0x68] sm:$0xff] %v650_v12  ;;  %v940_v51 = vpop.eup %939  ;;  %v651_v62 = vadd.f32 %v619_v46, %v441_v20  ;;  %p1050_p0 = por %p1049_p13, %p1048_p12 }
 0x163   :  { %698 = vst [vmem:[#allocation8 + $0xe8] sm:$0xff] %v666_v36  ;;  %v667_v55 = vadd.f32 %v635_v38, %v473_v45  ;;  %v620_v1 = vmul.f32 %v940_v51, %v588_v61 }
 0x164   :  { %683 = vst [vmem:[#allocation8 + $0x70] sm:$0xff] %v651_v62  ;;  %p1051_p1 = pnand %p1050_p0, %p1044_p11 }
 0x165   :  { %699 = vst [vmem:[#allocation8 + $0xf0] sm:$0xff] %v667_v55  ;;  %v652_v31 = vadd.f32 %v620_v1, %v443_v23 }
 0x167   :  { %684 = vst [vmem:[#allocation8 + $0x78] sm:$0xff] %v652_v31 }
 0x16b   :  { %v942_v58 = vpop.eup %941 }
 0x16c   :  { %v636_v47 = vmul.f32 %v942_v58, %v604_v60 }
 0x16e   :  { %v668_v59 = vadd.f32 %v636_v47, %v475_v7 }
 0x170   :  { %700 = vst [vmem:[#allocation8 + $0xf8] sm:$0xff] %v668_v59 }
 0x171   :  { %1054 = shalt.err (!%p1051_p1)
}
 0x172   :  { %776 = dma.vmem_to_hbm [thread:$0]  %s771_s21, 4096, %s1473_s4, [#allocation4], %s1073_s26, %s1073_s26, %s1074_s27  }
 0x173   :  { %1067 = dma.done.wait [#allocation4], 4096  }
 0x174   :  { %1068 = vsyncadd [#allocation4], 4294963200 }
 0x175   :  { %1069 = dma.done.wait [#allocation10], 8192  }
 0x176   :  { %1070 = vsyncadd [#allocation10], 4294959104 }
 0x177   :  { %810 = vsyncpa [#allocation3], 1 }
 0x178   :  { %811 = vsyncpa [#allocation6], 1 }
 0x179   :  { %812 = vsyncpa [#allocation4], 1 }
 0x17a   :  { %813 = vsyncpa [#allocation10], 1 }

</bundles_post_ra>
